<compile_context>
chip_gen: v6e
topology: v6e:2x2x1
jax: 0.10.0
libtpu: 0.0.40
codegen_flags: <defaults>
</compile_context>

<pallas_src>
import numpy as np

import jax
import jax.numpy as jnp
from jax.experimental import pallas as pl
from jax.experimental.pallas import tpu as pltpu


# ----------------------------- config (cfg) ---------------------------------
class Cfg:
    # cfg.out_channels; None -> in_channels (as in the torch module)
    out_channels = 64


def _round_up(x, m):
    return (x + m - 1) // m * m


def _choose_tiling(n, cap=8192, min_tile=256):
    """Pick (tile_n, n_pad) with tile_n a multiple of 128 dividing n_pad.

    Pads rows to a 128 multiple first, then picks a tile that keeps padding
    waste small and (when possible) gives >= 2 grid steps for megacore.
    """
    n128 = _round_up(max(n, 1), 128)
    if n128 <= min_tile:
        return n128, n128
    if n128 <= cap:
        # Split into two near-equal steps; waste <= 128 rows.
        tile = _round_up((n128 + 1) // 2, 128)
        return tile, _round_up(n128, tile)
    # Large problem: big tiles, but avoid the round_up(n, tile) padding cliff.
    tile = cap
    while tile > min_tile and (_round_up(n128, tile) - n128) > max(128, n128 // 16):
        tile //= 2
    return tile, _round_up(n128, tile)


# ------------------------------ Pallas kernel --------------------------------
def homogenous_embedding_kernel(x_ref, w_ref, b_ref, o_ref):
    # x_ref: (tile_N, C_in)   channels-last, read natively
    # w_ref: (C_in, C_out)    resident across the whole grid
    # b_ref: (1, C_out)       resident across the whole grid (f32)
    # o_ref: (tile_N, C_out)
    acc = jnp.dot(x_ref[...], w_ref[...], preferred_element_type=jnp.float32)
    o_ref[...] = (acc + b_ref[...]).astype(o_ref.dtype)


def homogenous_embedding_forward(x, weight, bias, *, tile_cap=8192):
    """y = x @ weight.T + bias with x channels-last [..., in_channels].

    weight: [out_channels, in_channels] (torch nn.Linear layout)
    bias:   [out_channels]
    """
    in_c = x.shape[-1]
    out_c, wc = weight.shape
    assert wc == in_c, (wc, in_c)

    lead = x.shape[:-1]
    n = int(np.prod(lead)) if lead else 1

    tile_n, n_pad = _choose_tiling(n, cap=tile_cap)

    x2d = x.reshape(max(n, 1), in_c)
    if n_pad != n:
        x2d = jnp.pad(x2d, ((0, n_pad - x2d.shape[0]), (0, 0)))

    w_t = jnp.transpose(weight).astype(x.dtype)          # (C_in, C_out), tiny
    b_row = bias.astype(jnp.float32).reshape(1, out_c)   # (1, C_out)

    grid = (n_pad // tile_n,)

    itemsize = jnp.dtype(x.dtype).itemsize
    cost = pl.CostEstimate(
        flops=2 * n_pad * in_c * out_c,
        transcendentals=0,
        bytes_accessed=n_pad * (in_c + out_c) * itemsize
        + (in_c * out_c) * itemsize + out_c * 4,
    )

    out = pl.pallas_call(
        homogenous_embedding_kernel,
        out_shape=jax.ShapeDtypeStruct((n_pad, out_c), x.dtype),
        grid_spec=pltpu.PrefetchScalarGridSpec(
            num_scalar_prefetch=0,
            grid=grid,
            in_specs=[
                pl.BlockSpec((tile_n, in_c), lambda i: (i, 0)),   # x tile
                pl.BlockSpec((in_c, out_c), lambda i: (0, 0)),    # weight
                pl.BlockSpec((1, out_c), lambda i: (0, 0)),       # bias
            ],
            out_specs=pl.BlockSpec((tile_n, out_c), lambda i: (i, 0)),
        ),
        compiler_params=pltpu.CompilerParams(
            dimension_semantics=("parallel",),
            vmem_limit_bytes=32 * 1024 * 1024),
        cost_estimate=cost,
    )(x2d, w_t, b_row)

    return out[:n].reshape(*lead, out_c)


# ------------------------------ reference (JAX) -------------------------------
def homogenous_embedding_reference(x, weight, bias):
    return jnp.einsum('...i,oi->...o', x, weight) + bias


# ------------------------------------ main ------------------------------------
if __name__ == "__main__":
    cfg = Cfg()
    in_channels = 4
    out_channels = cfg.out_channels if cfg.out_channels is not None else in_channels
    batch, h, w = 2, 16, 16           # 512 rows total (small example)

    key = jax.random.PRNGKey(0)
    kx, kw, kb = jax.random.split(key, 3)
    x = jax.random.normal(kx, (batch, h, w, in_channels), dtype=jnp.float32)

    # nn.Linear-style parameters: weight [out, in], bias [out].
    bound = 1.0 / np.sqrt(in_channels)
    weight = jax.random.uniform(kw, (out_channels, in_channels),
                                dtype=jnp.float32, minval=-bound, maxval=bound)
    bias = jax.random.uniform(kb, (out_channels,), dtype=jnp.float32,
                              minval=-bound, maxval=bound)

    out = homogenous_embedding_forward(x, weight, bias)
    out = jax.block_until_ready(out)

    ref = homogenous_embedding_reference(x, weight, bias)
    assert out.shape == (batch, h, w, out_channels), out.shape
    assert np.allclose(np.asarray(out), np.asarray(ref), atol=1e-4, rtol=1e-4), \
        float(np.max(np.abs(np.asarray(out) - np.asarray(ref))))

    # TODO(synk): set_iter(i) only stores cur_iter on the module and does not
    # affect forward(); intentionally not represented in the kernel.

    print("KERNEL_OK")
</pallas_src>

<mosaic_0001>
module attributes {stable_mosaic.version = 11 : i64} {
  func.func @homogenous_embedding_kernel(%arg0: i32, %arg1: memref<256x4xf32, #tpu.memory_space<vmem>>, %arg2: memref<4x64xf32, #tpu.memory_space<vmem>>, %arg3: memref<1x64xf32, #tpu.memory_space<vmem>>, %arg4: memref<256x64xf32, #tpu.memory_space<vmem>>) attributes {dimension_semantics = [#tpu.dimension_semantics<parallel>], iteration_bounds = array<i64: 2>, scalar_prefetch = 0 : i64, scratch_operands = 0 : i64, tpu.core_type = #tpu.core_type<tc>, window_params = [{transform_indices = @transform_0, window_bounds = array<i64: 256, 4>}, {pipeline_mode = #tpu.pipeline_mode<synchronous>, transform_indices = @transform_1, window_bounds = array<i64: 4, 64>}, {pipeline_mode = #tpu.pipeline_mode<synchronous>, transform_indices = @transform_2, window_bounds = array<i64: 1, 64>}, {transform_indices = @transform_3, window_bounds = array<i64: 256, 64>}]} {
    %c0 = arith.constant 0 : index
    %c0_0 = arith.constant 0 : index
    %0 = vector.load %arg1[%c0, %c0_0] : memref<256x4xf32, #tpu.memory_space<vmem>>, vector<256x4xf32>
    %c0_1 = arith.constant 0 : index
    %c0_2 = arith.constant 0 : index
    %1 = vector.load %arg2[%c0_1, %c0_2] : memref<4x64xf32, #tpu.memory_space<vmem>>, vector<4x64xf32>
    %cst = arith.constant dense<0.000000e+00> : vector<256x64xf32>
    %2 = tpu.matmul %0, %1, %cst {dimension_numbers = #tpu.dot_dimension_numbers<[1], [0], [0], [1], [0, 0, 1, 1], [], []>} : vector<256x4xf32>, vector<4x64xf32>, vector<256x64xf32> -> vector<256x64xf32>
    %c0_3 = arith.constant 0 : index
    %c0_4 = arith.constant 0 : index
    %3 = vector.load %arg3[%c0_3, %c0_4] : memref<1x64xf32, #tpu.memory_space<vmem>>, vector<1x64xf32>
    %4 = vector.broadcast %3 : vector<1x64xf32> to vector<256x64xf32>
    %5 = arith.addf %2, %4 : vector<256x64xf32>
    %c0_5 = arith.constant 0 : index
    %c0_6 = arith.constant 0 : index
    %6 = vector.load %arg4[%c0_5, %c0_6] : memref<256x64xf32, #tpu.memory_space<vmem>>, vector<256x64xf32>
    tpu.vector_store %arg4[%c0_5, %c0_6], %5 {strides = array<i32>} : memref<256x64xf32, #tpu.memory_space<vmem>>, vector<256x64xf32>,
    return
  }
  func.func @transform_0(%arg0: i32) -> (i32, i32) {
    %c0_i32 = arith.constant 0 : i32
    %c0_i32_0 = arith.constant 0 : i32
    return %arg0, %c0_i32 : i32, i32
  }
  func.func @transform_1(%arg0: i32) -> (i32, i32) {
    %c0_i32 = arith.constant 0 : i32
    %c0_i32_0 = arith.constant 0 : i32
    %c0_i32_1 = arith.constant 0 : i32
    return %c0_i32, %c0_i32_0 : i32, i32
  }
  func.func @transform_2(%arg0: i32) -> (i32, i32) {
    %c0_i32 = arith.constant 0 : i32
    %c0_i32_0 = arith.constant 0 : i32
    %c0_i32_1 = arith.constant 0 : i32
    return %c0_i32, %c0_i32_0 : i32, i32
  }
  func.func @transform_3(%arg0: i32) -> (i32, i32) {
    %c0_i32 = arith.constant 0 : i32
    %c0_i32_0 = arith.constant 0 : i32
    return %arg0, %c0_i32 : i32, i32
  }
}

</mosaic_0001>

<bundles_post_ra>
// kernel: tpu_custom_call.1
= control target key start
LH: loop header
LB: loop body
LE: loop exit
PB: predicated region body
PF: predicated region fallthrough
CT: control target
= control target key end

     0   :  { %s795_s12 = smov 0   ;;  %s991_s0 = inlined_call_operand.vmem [shape: f32[512,4], index: 0, kind: input, shape index: {}]   ;;  %s992_s1 = inlined_call_operand.vmem [shape: f32[4,64], index: 1, kind: input, shape index: {}]   ;;  %s993_s2 = inlined_call_operand.vmem [shape: f32[1,64], index: 2, kind: input, shape index: {}]   ;;  %s994_s3 = inlined_call_operand.vmem [shape: f32[512,64], index: 3, kind: output, shape index: {}]  }
   0x1 LB: > { %s629_s13 = sadd.s32 4294967295, %s773_s12   ;;  %p633_p0 = scmp.ge.s32.totalorder %s773_s12, 1  ;;  %s773_s12 = sphi %s795_s12, %s13_s12  }
   0x2   : > { %p138_p1 = scmp.lt.s32.totalorder %s773_s12, 3 }
   0x4   : > { %p139_p2 = pnand %p633_p0, %p138_p1 }
   0x5   : > { %s634_s16 = sshll.u32 (!%p139_p2), %s629_s13, 5 }
   0x6   : > { %142 = sbr.rel (%p139_p2) target bundleno = 243 (0xf3), region = 32  ;;  %p163_p3 = scmp.lt.s32.totalorder (!%p139_p2), %s634_s16, 63 }
   0xb   : > { %v206_v0 = vld [vmem:[%s992_s1] sm:$0xf]  ;;  %vm311_vm0 = vcmask 1043456   ;;  %s996_s16 = smov (!%p163_p3, %s634_s16), 63  ;;  %vm214_vm1 = vcmask 31744   ;;  %vm540_vm2 = vcmask 523264  }
   0xc   : > { %707 = vmatprep.subr.msk.mxu0 %vm311_vm0, %v206_v0  ;;  %757 = vmatprep.subr.msk.mxu1 %vm311_vm0, %v206_v0  ;;  %s635_s17 = sshll.u32 %s996_s16, 3  ;;  %v883_v33 = vld [vmem:[%s993_s2] ss:$0 sm:$0xff] }
   0xd   : > { %708 = vmatpush3.msk.msra.mxu0 %vm311_vm0, %v206_v0  ;;  %758 = vmatpush3.msk.msra.mxu1 %vm311_vm0, %v206_v0  ;;  %s814_s20 = scalar_lea.vmem %s991_s0, %s635_s17  ;;  %s890_s25 = scalar_lea.vmem %s994_s3, %s635_s17 }
   0xe   : > { %v174_v1 = vld [vmem:[%s814_s20] sm:$0xff]  ;;  %v175_v3 = vld [vmem:[%s814_s20 + $0x8] sm:$0xff]  ;;  %v176_v5 = vld [vmem:[%s814_s20 + $0x10] sm:$0xff] }
   0xf   : > { %v190_v2 = vld [vmem:[%s814_s20 + $0x80] sm:$0xff]  ;;  %709 = vmatprep.mubr.msk.f32.mxu0 %vm214_vm1, %v174_v1  ;;  %v191_v4 = vld [vmem:[%s814_s20 + $0x88] sm:$0xff]  ;;  %v192_v6 = vld [vmem:[%s814_s20 + $0x90] sm:$0xff] }
  0x10   : > { %733 = vmatprep.mubr.msk.f32.mxu1 %vm214_vm1, %v190_v2  ;;  %710 = vmatmul.mubr.msk.f32.vlgmr.msra.gmra.mxu0 %vm214_vm1, %v175_v3  ;;  %v177_v7 = vld [vmem:[%s814_s20 + $0x18] sm:$0xff]  ;;  %v178_v9 = vld [vmem:[%s814_s20 + $0x20] sm:$0xff]  ;;  %v179_v11 = vld [vmem:[%s814_s20 + $0x28] sm:$0xff] }
  0x11   : > { %734 = vmatmul.mubr.msk.f32.vlgmr.msra.gmra.mxu1 %vm214_vm1, %v191_v4  ;;  %712 = vmatprep.mubr.msk.f32.mxu0 %vm214_vm1, %v176_v5  ;;  %v193_v8 = vld [vmem:[%s814_s20 + $0x98] sm:$0xff]  ;;  %v194_v10 = vld [vmem:[%s814_s20 + $0xa0] sm:$0xff]  ;;  %v195_v12 = vld [vmem:[%s814_s20 + $0xa8] sm:$0xff] }
  0x12   : > { %736 = vmatprep.mubr.msk.f32.mxu1 %vm214_vm1, %v192_v6  ;;  %v180_v13 = vld [vmem:[%s814_s20 + $0x30] sm:$0xff]  ;;  %v181_v15 = vld [vmem:[%s814_s20 + $0x38] sm:$0xff]  ;;  %v182_v17 = vld [vmem:[%s814_s20 + $0x40] sm:$0xff] }
  0x13   : > { %v196_v14 = vld [vmem:[%s814_s20 + $0xb0] sm:$0xff]  ;;  %v197_v16 = vld [vmem:[%s814_s20 + $0xb8] sm:$0xff]  ;;  %v198_v18 = vld [vmem:[%s814_s20 + $0xc0] sm:$0xff] }
  0x14   : > { %713 = vmatmul.mubr.msk.f32.gmra.mxu0 %vm214_vm1, %v177_v7  ;;  %v183_v19 = vld [vmem:[%s814_s20 + $0x48] sm:$0xff]  ;;  %v184_v21 = vld [vmem:[%s814_s20 + $0x50] sm:$0xff]  ;;  %v185_v23 = vld [vmem:[%s814_s20 + $0x58] sm:$0xff] }
  0x15   : > { %737 = vmatmul.mubr.msk.f32.gmra.mxu1 %vm214_vm1, %v193_v8  ;;  %715 = vmatprep.mubr.msk.f32.mxu0 %vm214_vm1, %v178_v9  ;;  %v199_v20 = vld [vmem:[%s814_s20 + $0xc8] sm:$0xff]  ;;  %v200_v22 = vld [vmem:[%s814_s20 + $0xd0] sm:$0xff]  ;;  %v201_v24 = vld [vmem:[%s814_s20 + $0xd8] sm:$0xff] }
  0x16   : > { %739 = vmatprep.mubr.msk.f32.mxu1 %vm214_vm1, %v194_v10  ;;  %v186_v25 = vld [vmem:[%s814_s20 + $0x60] sm:$0xff]  ;;  %v187_v27 = vld [vmem:[%s814_s20 + $0x68] sm:$0xff]  ;;  %v188_v29 = vld [vmem:[%s814_s20 + $0x70] sm:$0xff] }
  0x17   : > { %v202_v26 = vld [vmem:[%s814_s20 + $0xe0] sm:$0xff]  ;;  %v203_v28 = vld [vmem:[%s814_s20 + $0xe8] sm:$0xff]  ;;  %v204_v30 = vld [vmem:[%s814_s20 + $0xf0] sm:$0xff] }
  0x18   : > { %716 = vmatmul.mubr.msk.f32.gmra.mxu0 %vm214_vm1, %v179_v11  ;;  %v189_v31 = vld [vmem:[%s814_s20 + $0x78] sm:$0xff] }
  0x19   : > { %740 = vmatmul.mubr.msk.f32.gmra.mxu1 %vm214_vm1, %v195_v12  ;;  %718 = vmatprep.mubr.msk.f32.mxu0 %vm214_vm1, %v180_v13  ;;  %v205_v32 = vld [vmem:[%s814_s20 + $0xf8] sm:$0xff] }
  0x1a   : > { %742 = vmatprep.mubr.msk.f32.mxu1 %vm214_vm1, %v196_v14 }
  0x1c   : > { %719 = vmatmul.mubr.msk.f32.gmra.mxu0 %vm214_vm1, %v181_v15 }
  0x1d   : > { %743 = vmatmul.mubr.msk.f32.gmra.mxu1 %vm214_vm1, %v197_v16  ;;  %721 = vmatprep.mubr.msk.f32.mxu0 %vm214_vm1, %v182_v17 }
  0x1e   : > { %745 = vmatprep.mubr.msk.f32.mxu1 %vm214_vm1, %v198_v18 }
  0x20   : > { %722 = vmatmul.mubr.msk.f32.gmra.mxu0 %vm214_vm1, %v183_v19 }
  0x21   : > { %746 = vmatmul.mubr.msk.f32.gmra.mxu1 %vm214_vm1, %v199_v20  ;;  %724 = vmatprep.mubr.msk.f32.mxu0 %vm214_vm1, %v184_v21 }
  0x22   : > { %748 = vmatprep.mubr.msk.f32.mxu1 %vm214_vm1, %v200_v22 }
  0x24   : > { %725 = vmatmul.mubr.msk.f32.gmra.mxu0 %vm214_vm1, %v185_v23 }
  0x25   : > { %749 = vmatmul.mubr.msk.f32.gmra.mxu1 %vm214_vm1, %v201_v24  ;;  %727 = vmatprep.mubr.msk.f32.mxu0 %vm214_vm1, %v186_v25 }
  0x26   : > { %751 = vmatprep.mubr.msk.f32.mxu1 %vm214_vm1, %v202_v26 }
  0x28   : > { %728 = vmatmul.mubr.msk.f32.gmra.mxu0 %vm214_vm1, %v187_v27 }
  0x29   : > { %752 = vmatmul.mubr.msk.f32.gmra.mxu1 %vm214_vm1, %v203_v28  ;;  %730 = vmatprep.mubr.msk.f32.mxu0 %vm214_vm1, %v188_v29 }
  0x2a   : > { %754 = vmatprep.mubr.msk.f32.mxu1 %vm214_vm1, %v204_v30 }
  0x2c   : > { %731 = vmatmul.mubr.msk.f32.gmra.mxu0 %vm214_vm1, %v189_v31 }
  0x2d   : > { %755 = vmatmul.mubr.msk.f32.gmra.mxu1 %vm214_vm1, %v205_v32 }
  0xd0   : > { %v711_v34 = vpop.f32.mrf.mxu0 }
  0xd1   : > { %v735_v35 = vpop.f32.mrf.mxu1  ;;  %v387_v36 = vadd.f32 %v711_v34, %v883_v33 }
  0xd2   : > { %v467_v37 = vadd.f32 %v735_v35, %v883_v33  ;;  %v381_v38 = vpop.f32.mrf.mxu0 }
  0xd3   : > { %v461_v39 = vpop.f32.mrf.mxu1  ;;  %542 = vst.msk [vmem:[%s890_s25 + $0x8] sm:$0xff] %vm540_vm2, %v387_v36  ;;  %v382_v40 = vadd.f32 %v883_v33, %v381_v38 }
  0xd4   : > { %558 = vst.msk [vmem:[%s890_s25 + $0x88] sm:$0xff] %vm540_vm2, %v467_v37  ;;  %v462_v41 = vadd.f32 %v883_v33, %v461_v39  ;;  %v714_v42 = vpop.f32.mrf.mxu0 }
  0xd5   : > { %v738_v43 = vpop.f32.mrf.mxu1  ;;  %541 = vst.msk [vmem:[%s890_s25] sm:$0xff] %vm540_vm2, %v382_v40  ;;  %v397_v44 = vadd.f32 %v714_v42, %v883_v33 }
  0xd6   : > { %557 = vst.msk [vmem:[%s890_s25 + $0x80] sm:$0xff] %vm540_vm2, %v462_v41  ;;  %v477_v45 = vadd.f32 %v738_v43, %v883_v33  ;;  %v391_v46 = vpop.f32.mrf.mxu0 }
  0xd7   : > { %v471_v47 = vpop.f32.mrf.mxu1  ;;  %544 = vst.msk [vmem:[%s890_s25 + $0x18] sm:$0xff] %vm540_vm2, %v397_v44  ;;  %v392_v48 = vadd.f32 %v883_v33, %v391_v46 }
  0xd8   : > { %560 = vst.msk [vmem:[%s890_s25 + $0x98] sm:$0xff] %vm540_vm2, %v477_v45  ;;  %v472_v49 = vadd.f32 %v883_v33, %v471_v47  ;;  %v717_v50 = vpop.f32.mrf.mxu0 }
  0xd9   : > { %v741_v51 = vpop.f32.mrf.mxu1  ;;  %543 = vst.msk [vmem:[%s890_s25 + $0x10] sm:$0xff] %vm540_vm2, %v392_v48  ;;  %v407_v52 = vadd.f32 %v717_v50, %v883_v33 }
  0xda   : > { %559 = vst.msk [vmem:[%s890_s25 + $0x90] sm:$0xff] %vm540_vm2, %v472_v49  ;;  %v487_v53 = vadd.f32 %v741_v51, %v883_v33  ;;  %v401_v54 = vpop.f32.mrf.mxu0 }
  0xdb   : > { %v481_v55 = vpop.f32.mrf.mxu1  ;;  %546 = vst.msk [vmem:[%s890_s25 + $0x28] sm:$0xff] %vm540_vm2, %v407_v52  ;;  %v402_v56 = vadd.f32 %v883_v33, %v401_v54 }
  0xdc   : > { %562 = vst.msk [vmem:[%s890_s25 + $0xa8] sm:$0xff] %vm540_vm2, %v487_v53  ;;  %v482_v57 = vadd.f32 %v883_v33, %v481_v55  ;;  %v720_v58 = vpop.f32.mrf.mxu0 }
  0xdd   : > { %v744_v59 = vpop.f32.mrf.mxu1  ;;  %545 = vst.msk [vmem:[%s890_s25 + $0x20] sm:$0xff] %vm540_vm2, %v402_v56  ;;  %v417_v60 = vadd.f32 %v720_v58, %v883_v33 }
  0xde   : > { %561 = vst.msk [vmem:[%s890_s25 + $0xa0] sm:$0xff] %vm540_vm2, %v482_v57  ;;  %v497_v61 = vadd.f32 %v744_v59, %v883_v33  ;;  %v411_v62 = vpop.f32.mrf.mxu0 }
  0xdf   : > { %v491_v63 = vpop.f32.mrf.mxu1  ;;  %548 = vst.msk [vmem:[%s890_s25 + $0x38] sm:$0xff] %vm540_vm2, %v417_v60  ;;  %v412_v0 = vadd.f32 %v883_v33, %v411_v62 }
  0xe0   : > { %564 = vst.msk [vmem:[%s890_s25 + $0xb8] sm:$0xff] %vm540_vm2, %v497_v61  ;;  %v492_v1 = vadd.f32 %v883_v33, %v491_v63  ;;  %v723_v2 = vpop.f32.mrf.mxu0 }
  0xe1   : > { %v747_v3 = vpop.f32.mrf.mxu1  ;;  %547 = vst.msk [vmem:[%s890_s25 + $0x30] sm:$0xff] %vm540_vm2, %v412_v0  ;;  %v427_v4 = vadd.f32 %v723_v2, %v883_v33 }
  0xe2   : > { %563 = vst.msk [vmem:[%s890_s25 + $0xb0] sm:$0xff] %vm540_vm2, %v492_v1  ;;  %v507_v5 = vadd.f32 %v747_v3, %v883_v33  ;;  %v421_v6 = vpop.f32.mrf.mxu0 }
  0xe3   : > { %v501_v7 = vpop.f32.mrf.mxu1  ;;  %550 = vst.msk [vmem:[%s890_s25 + $0x48] sm:$0xff] %vm540_vm2, %v427_v4  ;;  %v422_v8 = vadd.f32 %v883_v33, %v421_v6 }
  0xe4   : > { %566 = vst.msk [vmem:[%s890_s25 + $0xc8] sm:$0xff] %vm540_vm2, %v507_v5  ;;  %v502_v9 = vadd.f32 %v883_v33, %v501_v7  ;;  %v726_v10 = vpop.f32.mrf.mxu0 }
  0xe5   : > { %v750_v11 = vpop.f32.mrf.mxu1  ;;  %549 = vst.msk [vmem:[%s890_s25 + $0x40] sm:$0xff] %vm540_vm2, %v422_v8  ;;  %v437_v12 = vadd.f32 %v726_v10, %v883_v33 }
  0xe6   : > { %565 = vst.msk [vmem:[%s890_s25 + $0xc0] sm:$0xff] %vm540_vm2, %v502_v9  ;;  %v517_v13 = vadd.f32 %v750_v11, %v883_v33  ;;  %v431_v14 = vpop.f32.mrf.mxu0 }
  0xe7   : > { %v511_v15 = vpop.f32.mrf.mxu1  ;;  %552 = vst.msk [vmem:[%s890_s25 + $0x58] sm:$0xff] %vm540_vm2, %v437_v12  ;;  %v432_v16 = vadd.f32 %v883_v33, %v431_v14 }
  0xe8   : > { %568 = vst.msk [vmem:[%s890_s25 + $0xd8] sm:$0xff] %vm540_vm2, %v517_v13  ;;  %v512_v17 = vadd.f32 %v883_v33, %v511_v15  ;;  %v729_v18 = vpop.f32.mrf.mxu0 }
  0xe9   : > { %v753_v19 = vpop.f32.mrf.mxu1  ;;  %551 = vst.msk [vmem:[%s890_s25 + $0x50] sm:$0xff] %vm540_vm2, %v432_v16  ;;  %v447_v20 = vadd.f32 %v729_v18, %v883_v33 }
  0xea   : > { %567 = vst.msk [vmem:[%s890_s25 + $0xd0] sm:$0xff] %vm540_vm2, %v512_v17  ;;  %v527_v21 = vadd.f32 %v753_v19, %v883_v33  ;;  %v441_v22 = vpop.f32.mrf.mxu0 }
  0xeb   : > { %v521_v23 = vpop.f32.mrf.mxu1  ;;  %554 = vst.msk [vmem:[%s890_s25 + $0x68] sm:$0xff] %vm540_vm2, %v447_v20  ;;  %v442_v24 = vadd.f32 %v883_v33, %v441_v22 }
  0xec   : > { %570 = vst.msk [vmem:[%s890_s25 + $0xe8] sm:$0xff] %vm540_vm2, %v527_v21  ;;  %v522_v25 = vadd.f32 %v883_v33, %v521_v23  ;;  %v732_v26 = vpop.f32.mrf.mxu0 }
  0xed   : > { %v756_v27 = vpop.f32.mrf.mxu1  ;;  %553 = vst.msk [vmem:[%s890_s25 + $0x60] sm:$0xff] %vm540_vm2, %v442_v24  ;;  %v457_v28 = vadd.f32 %v732_v26, %v883_v33 }
  0xee   : > { %569 = vst.msk [vmem:[%s890_s25 + $0xe0] sm:$0xff] %vm540_vm2, %v522_v25  ;;  %v537_v29 = vadd.f32 %v756_v27, %v883_v33  ;;  %v451_v30 = vpop.f32.mrf.mxu0 }
  0xef   : > { %v531_v31 = vpop.f32.mrf.mxu1  ;;  %556 = vst.msk [vmem:[%s890_s25 + $0x78] sm:$0xff] %vm540_vm2, %v457_v28  ;;  %v452_v32 = vadd.f32 %v883_v33, %v451_v30 }
  0xf0   : > { %572 = vst.msk [vmem:[%s890_s25 + $0xf8] sm:$0xff] %vm540_vm2, %v537_v29  ;;  %v532_v34 = vadd.f32 %v883_v33, %v531_v31 }
  0xf1   : > { %555 = vst.msk [vmem:[%s890_s25 + $0x70] sm:$0xff] %vm540_vm2, %v452_v32 }
  0xf2   : > { %571 = vst.msk [vmem:[%s890_s25 + $0xf0] sm:$0xff] %vm540_vm2, %v532_v34 }
  0xf3 PF: > { %s13_s12 = sadd.s32 1, %s773_s12  }
  0xf4   : > { %p10_p4 = scmp.ge.s32.totalorder %s13_s12, 4  }
  0xf6   :  { %12 = sbr.rel (!%p10_p4) target bundleno = 1 (0x1), region = 62 }

</bundles_post_ra>
